<compile_context>
chip_gen: v7x
topology: tpu7x:2x2x1
jax: 0.10.0
libtpu: 0.0.40
codegen_flags: <defaults>
</compile_context>

<pallas_src>
import functools

import jax
import jax.numpy as jnp
from jax.experimental import pallas as pl
from jax.experimental.pallas import tpu as pltpu


def _round_up(x: int, m: int) -> int:
    return (x + m - 1) // m * m


# ----------------------------------------------------------------------------- kernel
def _blast_kernel(x_ref, ct_ref, w2_ref, bias_ref, o_ref, y_ref, *,
                  nb1, ic, rank, compute_dtype):
    # Stage 1 (once per row tile): y_q = x_q @ C[q].T, written into the VMEM scratch
    # so it is reused across every output-column tile of this row tile.
    @pl.when(pl.program_id(1) == 0)
    def _():
        x = x_ref[...].astype(compute_dtype)          # in-kernel cast: bf16 MXU path
        for q in range(nb1):                          # nb1 is small and static
            y_ref[:, q * rank:(q + 1) * rank] = jnp.dot(
                x[:, q * ic:(q + 1) * ic], ct_ref[q],
                preferred_element_type=jnp.float32)

    # Stage 2: one dense MXU matmul against the D-folded-into-B weight slab.
    out = jnp.dot(y_ref[...].astype(compute_dtype), w2_ref[...],
                  preferred_element_type=jnp.float32)
    # Fused bias add + single lane-dense store per (row, col) tile.
    o_ref[...] = (out + bias_ref[...]).astype(o_ref.dtype)


# --------------------------------------------------------------------- weight assembly
def assemble_blast_weights(B, C, D, bias, compute_dtype=jnp.bfloat16):
    """Fold D into B and transpose C once (exact reordering).

    Cache the result across forwards when B/C/D are static — this hoists the
    O(nb1*in*rank + nb1*rank*out) HBM traffic of assembly off the per-call path.
    """
    nb0, op, rank = B.shape
    nb1, _, ic = C.shape
    out_features = nb0 * op
    ct = jnp.transpose(C, (0, 2, 1)).astype(compute_dtype)          # (nb1, ic, rank)
    w2 = jnp.einsum('pqr,por->qrpo', D, B).reshape(nb1 * rank, out_features)
    w2 = w2.astype(compute_dtype)                                   # (nb1*rank, out)
    if bias is None:
        bias2 = jnp.zeros((1, out_features), jnp.float32)
    else:
        bias2 = bias.reshape(1, out_features).astype(jnp.float32)
    return ct, w2, bias2


# ------------------------------------------------------------------------ tile picking
def _vmem_capacity_bytes() -> int:
    try:
        cap = int(pltpu.get_tpu_info().vmem_capacity_bytes)
        if cap >= (16 << 20):
            return cap
    except Exception:
        pass
    return 64 << 20   # conservative fallback = v7x per-TensorCore VMEM


def _tile_bytes(tn, tno, in_f, krank, x_it, c_it, o_it, w2_nbuf):
    # Per-grid-step VMEM residency, including Mosaic f32 temporaries/cast copies.
    return (2 * tn * in_f * x_it            # double-buffered x row tile
            + tn * in_f * c_it              # in-kernel bf16 copy of the x tile
            + 2 * tn * tno * o_it           # double-buffered output tile
            + w2_nbuf * krank * tno * c_it  # W2 column slab(s)
            + w2_nbuf * tno * 4             # bias tile(s), f32
            + tn * krank * (4 + c_it)       # y scratch (f32) + its bf16 copy
            + 2 * tn * tno * 4)             # f32 matmul result + bias-add temp


def _pick_tiles(in_f, out_f, krank, x_it, c_it, o_it, budget):
    # Path 1: whole output width resident; W2/bias are single-buffered constants.
    for tn in (1024, 512, 256, 128, 64, 32, 16):
        if _tile_bytes(tn, out_f, in_f, krank, x_it, c_it, o_it, 1) <= budget:
            return tn, out_f
    # Path 2: tile output columns; W2/bias become pipelined (double-buffered).
    tno_cands = [t for t in (2048, 1024, 512, 256, 128) if t < out_f]
    for tn in (512, 256, 128, 64, 32, 16):
        for tno in tno_cands:
            if _tile_bytes(tn, tno, in_f, krank, x_it, c_it, o_it, 2) <= budget:
                return tn, tno
    # Fallback: smallest legal tiles; compile will flag it if even this overflows.
    return 16, (out_f if out_f <= 128 else 128)


# --------------------------------------------------------------------------- pallas_call
def _blast_apply(x2, ct, w2, bias2, compute_dtype):
    n, in_f = x2.shape
    nb1, ic, rank = ct.shape
    krank, out_f = w2.shape

    x_it = jnp.dtype(x2.dtype).itemsize
    c_it = jnp.dtype(compute_dtype).itemsize
    o_it = x_it

    # Chip-aware scoped-VMEM ceiling: ~100 MiB on 128-MiB parts (v5e/v6e),
    # ~48 MiB on 64-MiB-per-TC parts (v7x); keep Mosaic scratch headroom.
    cap = _vmem_capacity_bytes()
    vmem_limit = max(32 << 20, min(cap - (16 << 20), 100 << 20))
    ct_bytes = nb1 * _round_up(ic, 8) * _round_up(rank, 128) * c_it   # padded VMEM layout
    budget = max(vmem_limit - ct_bytes - (4 << 20), 1 << 20)

    tn, tno = _pick_tiles(in_f, out_f, krank, x_it, c_it, o_it, budget)
    if n <= tn:
        tn = n                     # single row tile; a full-dim block is always legal
    ncols = pl.cdiv(out_f, tno) if tno < out_f else 1
    grid = (pl.cdiv(n, tn), ncols)     # no padding: ragged tail blocks are masked

    def const_spec(shape, imap, single):
        # Constant-index inputs only need one VMEM buffer.
        if single:
            return pl.BlockSpec(shape, imap, pipeline_mode=pl.Buffered(1))
        return pl.BlockSpec(shape, imap)

    kernel = functools.partial(_blast_kernel, nb1=nb1, ic=ic, rank=rank,
                               compute_dtype=compute_dtype)

    cost = pl.CostEstimate(
        flops=2 * n * in_f * rank + 2 * n * krank * out_f,
        transcendentals=0,
        bytes_accessed=(n * in_f * x_it + n * out_f * o_it
                        + ct.size * c_it + w2.size * c_it + bias2.size * 4),
    )

    return pl.pallas_call(
        kernel,
        out_shape=jax.ShapeDtypeStruct((n, out_f), x2.dtype),
        grid_spec=pltpu.PrefetchScalarGridSpec(
            num_scalar_prefetch=0,
            grid=grid,
            in_specs=[
                pl.BlockSpec((tn, in_f), lambda i, j: (i, 0)),
                const_spec((nb1, ic, rank), lambda i, j: (0, 0, 0), True),
                const_spec((krank, tno), lambda i, j: (0, j), ncols == 1),
                const_spec((1, tno), lambda i, j: (0, j), ncols == 1),
            ],
            out_specs=pl.BlockSpec((tn, tno), lambda i, j: (i, j)),
            scratch_shapes=[pltpu.VMEM((tn, krank), jnp.float32)],
        ),
        compiler_params=pltpu.CompilerParams(
            dimension_semantics=("parallel", "arbitrary"),
            vmem_limit_bytes=int(vmem_limit),
        ),
        cost_estimate=cost,
    )(x2, ct, w2, bias2)


@functools.partial(jax.jit, static_argnames=("compute_dtype",))
def blast_linear(x, B, C, D, bias=None, *, compute_dtype=jnp.bfloat16):
    """BlastLinear forward (precompute_matrix=False). compute_dtype=jnp.float32
    reproduces the module's f32 numerics exactly; bfloat16 (default) keeps f32
    accumulation but uses the fast MXU path and halves weight HBM/VMEM."""
    nb0, op, rank = B.shape
    nb1, _, ic = C.shape
    in_features = nb1 * ic
    out_features = nb0 * op
    assert x.shape[-1] == in_features
    ct, w2, bias2 = assemble_blast_weights(B, C, D, bias, compute_dtype=compute_dtype)
    x2 = x.reshape(-1, in_features)
    out = _blast_apply(x2, ct, w2, bias2, compute_dtype)
    return out.reshape(*x.shape[:-1], out_features)


# --------------------------------------------------------------------------- reference
def blast_linear_ref(x, B, C, D, bias):
    """Pure-JAX reference mirroring the PyTorch forward (f32)."""
    nb0, op, rank = B.shape
    nb1, _, ic = C.shape
    x2 = x.reshape(-1, nb1 * ic)
    xq = x2.reshape(-1, nb1, ic).transpose(1, 0, 2)        # (nb1, N, ic)
    y = jnp.einsum('qnc,qrc->qnr', xq, C)                  # (nb1, N, rank)
    z = jnp.einsum('qnr,pqr->pnr', y, D)                   # (nb0, N, rank)
    out = jnp.einsum('pnr,por->pno', z, B)                 # (nb0, N, op)
    out = out.transpose(1, 0, 2).reshape(*x.shape[:-1], nb0 * op)
    return out if bias is None else out + bias


if __name__ == "__main__":
    # Small shapes consistent with the module:
    #   in_features=32, out_features=32, num_blocks=(2, 2), rank=8, x: (2, 8, 32)
    in_features, out_features = 32, 32
    nb0, nb1 = 2, 2
    rank = 8
    batch, seq = 2, 8

    key = jax.random.PRNGKey(0)
    kx, kb, kc, kd, kbias = jax.random.split(key, 5)

    x = jax.random.normal(kx, (batch, seq, in_features), dtype=jnp.float32)
    B = jax.random.normal(kb, (nb0, out_features // nb0, rank), dtype=jnp.float32) * 0.1
    C = jax.random.normal(kc, (nb1, rank, in_features // nb1), dtype=jnp.float32) * 0.1
    D = jax.random.normal(kd, (nb0, nb1, rank), dtype=jnp.float32) * 0.1
    bias = jax.random.normal(kbias, (out_features,), dtype=jnp.float32) * 0.1

    ref = blast_linear_ref(x, B, C, D, bias)

    # Default mixed-precision path (bf16 compute, f32 accumulation).
    out = jax.block_until_ready(blast_linear(x, B, C, D, bias))
    assert out.shape == (batch, seq, out_features)
    assert jnp.allclose(out, ref, atol=2e-2, rtol=2e-2), \
        float(jnp.max(jnp.abs(out - ref)))

    # Exact f32 path must match tightly.
    out_f32 = jax.block_until_ready(
        blast_linear(x, B, C, D, bias, compute_dtype=jnp.float32))
    assert jnp.allclose(out_f32, ref, atol=1e-4, rtol=1e-4)

    # Ragged row count (exercises the padding-free masked tail-block path: N=2100, tn=1024).
    x_big = jax.random.normal(kx, (3, 700, in_features), dtype=jnp.float32)
    out_big = jax.block_until_ready(blast_linear(x_big, B, C, D, bias))
    ref_big = blast_linear_ref(x_big, B, C, D, bias)
    assert jnp.allclose(out_big, ref_big, atol=2e-2, rtol=2e-2)

    print("KERNEL_OK")
</pallas_src>

<mosaic_0001>
module attributes {stable_mosaic.version = 11 : i64} {
  func.func @_blast_kernel(%arg0: i32, %arg1: i32, %arg2: memref<16x32xf32, #tpu.memory_space<vmem>>, %arg3: memref<2x16x8xbf16, #tpu.memory_space<vmem>>, %arg4: memref<16x32xbf16, #tpu.memory_space<vmem>>, %arg5: memref<1x32xf32, #tpu.memory_space<vmem>>, %arg6: memref<16x32xf32, #tpu.memory_space<vmem>>, %arg7: memref<16x16xf32, #tpu.memory_space<vmem>>) attributes {dimension_semantics = [#tpu.dimension_semantics<parallel>, #tpu.dimension_semantics<arbitrary>], iteration_bounds = array<i64: 1, 1>, scalar_prefetch = 0 : i64, scratch_operands = 1 : i64, tpu.core_type = #tpu.core_type<tc>, window_params = [{transform_indices = @transform_0, window_bounds = array<i64: 16, 32>}, {pipeline_mode = #tpu.pipeline_mode<synchronous>, transform_indices = @transform_1, window_bounds = array<i64: 2, 16, 8>}, {pipeline_mode = #tpu.pipeline_mode<synchronous>, transform_indices = @transform_2, window_bounds = array<i64: 16, 32>}, {pipeline_mode = #tpu.pipeline_mode<synchronous>, transform_indices = @transform_3, window_bounds = array<i64: 1, 32>}, {transform_indices = @transform_4, window_bounds = array<i64: 16, 32>}]} {
    %c0_i32 = arith.constant 0 : i32
    %0 = arith.cmpi eq, %arg1, %c0_i32 : i32
    %1 = arith.extui %0 : i1 to i32
    %c0_i32_0 = arith.constant 0 : i32
    %2 = arith.cmpi ne, %1, %c0_i32_0 : i32
    scf.if %2 {
      %c0_8 = arith.constant 0 : index
      %c0_9 = arith.constant 0 : index
      %11 = vector.load %arg2[%c0_8, %c0_9] : memref<16x32xf32, #tpu.memory_space<vmem>>, vector<16x32xf32>
      %12 = arith.truncf %11 : vector<16x32xf32> to vector<16x32xbf16>
      %13 = vector.extract_strided_slice %12 {offsets = [0, 0], sizes = [16, 16], strides = [1, 1]} : vector<16x32xbf16> to vector<16x16xbf16>
      %c0_10 = arith.constant 0 : index
      %c0_11 = arith.constant 0 : index
      %c0_12 = arith.constant 0 : index
      %14 = vector.load %arg3[%c0_10, %c0_11, %c0_12] : memref<2x16x8xbf16, #tpu.memory_space<vmem>>, vector<1x16x8xbf16>
      %15 = vector.shape_cast %14 : vector<1x16x8xbf16> to vector<16x8xbf16>
      %cst_13 = arith.constant dense<0.000000e+00> : vector<16x8xf32>
      %16 = tpu.matmul %13, %15, %cst_13 {dimension_numbers = #tpu.dot_dimension_numbers<[1], [0], [0], [1], [0, 0, 1, 1], [], []>} : vector<16x16xbf16>, vector<16x8xbf16>, vector<16x8xf32> -> vector<16x8xf32>
      %c0_14 = arith.constant 0 : index
      %c0_15 = arith.constant 0 : index
      %17 = vector.load %arg7[%c0_14, %c0_15] : memref<16x16xf32, #tpu.memory_space<vmem>>, vector<16x8xf32>
      tpu.vector_store %arg7[%c0_14, %c0_15], %16 {strides = array<i32>} : memref<16x16xf32, #tpu.memory_space<vmem>>, vector<16x8xf32>,
      %18 = vector.extract_strided_slice %12 {offsets = [0, 16], sizes = [16, 16], strides = [1, 1]} : vector<16x32xbf16> to vector<16x16xbf16>
      %c1 = arith.constant 1 : index
      %c0_16 = arith.constant 0 : index
      %c0_17 = arith.constant 0 : index
      %19 = vector.load %arg3[%c1, %c0_16, %c0_17] : memref<2x16x8xbf16, #tpu.memory_space<vmem>>, vector<1x16x8xbf16>
      %20 = vector.shape_cast %19 : vector<1x16x8xbf16> to vector<16x8xbf16>
      %cst_18 = arith.constant dense<0.000000e+00> : vector<16x8xf32>
      %21 = tpu.matmul %18, %20, %cst_18 {dimension_numbers = #tpu.dot_dimension_numbers<[1], [0], [0], [1], [0, 0, 1, 1], [], []>} : vector<16x16xbf16>, vector<16x8xbf16>, vector<16x8xf32> -> vector<16x8xf32>
      %c0_19 = arith.constant 0 : index
      %c8 = arith.constant 8 : index
      %22 = vector.load %arg7[%c0_19, %c8] : memref<16x16xf32, #tpu.memory_space<vmem>>, vector<16x8xf32>
      tpu.vector_store %arg7[%c0_19, %c8], %21 {strides = array<i32>} : memref<16x16xf32, #tpu.memory_space<vmem>>, vector<16x8xf32>,
    } else {
    }
    %c0 = arith.constant 0 : index
    %c0_1 = arith.constant 0 : index
    %3 = vector.load %arg7[%c0, %c0_1] : memref<16x16xf32, #tpu.memory_space<vmem>>, vector<16x16xf32>
    %4 = arith.truncf %3 : vector<16x16xf32> to vector<16x16xbf16>
    %c0_2 = arith.constant 0 : index
    %c0_3 = arith.constant 0 : index
    %5 = vector.load %arg4[%c0_2, %c0_3] : memref<16x32xbf16, #tpu.memory_space<vmem>>, vector<16x32xbf16>
    %cst = arith.constant dense<0.000000e+00> : vector<16x32xf32>
    %6 = tpu.matmul %4, %5, %cst {dimension_numbers = #tpu.dot_dimension_numbers<[1], [0], [0], [1], [0, 0, 1, 1], [], []>} : vector<16x16xbf16>, vector<16x32xbf16>, vector<16x32xf32> -> vector<16x32xf32>
    %c0_4 = arith.constant 0 : index
    %c0_5 = arith.constant 0 : index
    %7 = vector.load %arg5[%c0_4, %c0_5] : memref<1x32xf32, #tpu.memory_space<vmem>>, vector<1x32xf32>
    %8 = vector.broadcast %7 : vector<1x32xf32> to vector<16x32xf32>
    %9 = arith.addf %6, %8 : vector<16x32xf32>
    %c0_6 = arith.constant 0 : index
    %c0_7 = arith.constant 0 : index
    %10 = vector.load %arg6[%c0_6, %c0_7] : memref<16x32xf32, #tpu.memory_space<vmem>>, vector<16x32xf32>
    tpu.vector_store %arg6[%c0_6, %c0_7], %9 {strides = array<i32>} : memref<16x32xf32, #tpu.memory_space<vmem>>, vector<16x32xf32>,
    return
  }
  func.func @transform_0(%arg0: i32, %arg1: i32) -> (i32, i32) {
    %c0_i32 = arith.constant 0 : i32
    %c0_i32_0 = arith.constant 0 : i32
    return %arg0, %c0_i32 : i32, i32
  }
  func.func @transform_1(%arg0: i32, %arg1: i32) -> (i32, i32, i32) {
    %c0_i32 = arith.constant 0 : i32
    %c0_i32_0 = arith.constant 0 : i32
    %c0_i32_1 = arith.constant 0 : i32
    %c0_i32_2 = arith.constant 0 : i32
    return %c0_i32, %c0_i32_0, %c0_i32_1 : i32, i32, i32
  }
  func.func @transform_2(%arg0: i32, %arg1: i32) -> (i32, i32) {
    %c0_i32 = arith.constant 0 : i32
    %c0_i32_0 = arith.constant 0 : i32
    return %c0_i32, %arg1 : i32, i32
  }
  func.func @transform_3(%arg0: i32, %arg1: i32) -> (i32, i32) {
    %c0_i32 = arith.constant 0 : i32
    %c0_i32_0 = arith.constant 0 : i32
    return %c0_i32, %arg1 : i32, i32
  }
  func.func @transform_4(%arg0: i32, %arg1: i32) -> (i32, i32) {
    %c0_i32 = arith.constant 0 : i32
    return %arg0, %arg1 : i32, i32
  }
}

</mosaic_0001>

<bundles_post_ra>
// kernel: blast_linear.1
= control target key start
LH: loop header
LB: loop body
LE: loop exit
PB: predicated region body
PF: predicated region fallthrough
CT: control target
= control target key end

     0   :  { %v297_v3 = vmov 0.0   ;;  %vm298_vm0 = vmmov 0   ;;  %s299_s23 = smov 112   ;;  %s364_s0 = inlined_call_operand.vmem [shape: f32[16,32], index: 0, kind: input, shape index: {}]   ;;  %s365_s1 = inlined_call_operand.vmem [shape: bf16[2,16,8], index: 1, kind: input, shape index: {}]   ;;  %s366_s2 = inlined_call_operand.vmem [shape: bf16[16,32], index: 2, kind: input, shape index: {}]   ;;  %s367_s3 = inlined_call_operand.vmem [shape: f32[1,32], index: 3, kind: input, shape index: {}]   ;;  %s368_s4 = inlined_call_operand.hbm [shape: f32[16,32], index: 4, kind: output, shape index: {}]  }
   0x1   :  { %v23_v0 = vld [vmem:[%s364_s0] sm:$0xff]  ;;  %v24_v1 = vld [vmem:[%s364_s0 + $0x8] sm:$0xff]  ;;  %252 = vmatprep.subr.bf16.mxu1 %v297_v3  ;;  %246 = vmatprep.subr.bf16.mxu0 %v297_v3 }
   0x2   :  { %v25_v2 = vpack.c.bf16 %v24_v1, %v23_v0  ;;  %v270_v4 = vld [vmem:[%s365_s1 + $0x8] sm:$0xff]   ;;  %v271_v5 = vld [vmem:[%s365_s1] sm:$0xff]   ;;  %254 = vmatprep.mubr.msk.bf16.mxu1 %vm298_vm0, %v297_v3  ;;  %248 = vmatprep.mubr.msk.bf16.mxu0 %vm298_vm0, %v297_v3 }
   0x3   :  { %253 = vmatpush3.bf16.msra.mxu1 %v270_v4 }
   0x4   :  { %86 = vrot.lane.b32.xlu0 %v25_v2, %s299_s23 }
   0x5   :  { %9 = vsyncpa [#allocation4], 0  ;;  %247 = vmatpush3.bf16.msra.mxu0 %v271_v5  ;;  %vm34_vm1 = vcmask 130048   ;;  %vm79_vm2 = vcmask 64512   ;;  %v272_v11 = vld [vmem:[%s366_s2] sm:$0xff]   ;;  %s300_s24 = smov 8  }
   0x6   :  { %258 = vmatprep.subr.bf16.mxu0 %v297_v3  ;;  %vm146_vm3 = vcmask 130112   ;;  %v237_v21 = vld [vmem:[%s367_s3] ss:$0 sm:$0xff]  ;;  %vm212_vm4 = vcmask 261120   ;;  %s301_s26 = smov [#allocation3]  }
   0x7   :  { %s220_s27 = sshll.u32 %s301_s26, 4  ;;  %s221_s27 = int_to_ptr.vmem [resolvable:$true] %s220_s27 }
   0x8   :  { %249 = vmatmul.mubr.msk.bf16.vlgmr.msra.gmra.mrb[0].mxu0 %vm34_vm1, %v25_v2  ;;  %s273_s28 = scalar_lea.vmem %s221_s27, 256  ;;  %p278_p1 = scmp.lt.s32.totalorder %s221_s27, %s221_s27 }
   0x9   :  { %260 = vmatprep.mubr.msk.bf16.mxu0 %vm298_vm0, %v297_v3  ;;  %259 = vmatpush3.bf16.msra.mxu0 %v272_v11  ;;  %p274_p0 = scmp.ne.s32.totalorder %s221_s27, %s273_s28  ;;  %p279_p2 = scmp.lt.s32.totalorder %s273_s28, %s273_s28 }
   0xb   :  { %p280_p3 = por %p279_p2, %p278_p1 }
   0xd   :  { %p281_p4 = pnand %p280_p3, %p274_p0 }
  0x76   :  { %v87_v6 = vpop.permute.xlu0 %86 }
  0x77   :  { %255 = vmatmul.mubr.msk.bf16.vlgmr.msra.gmra.mrb[0].mxu1 %vm34_vm1, %v87_v6 }
  0xdb   :  { %v72_v7 = vpop.f32.mrb[0].mxu0 }
  0xdc   :  { %80 = vst.msk [vmem:[#allocation2] sm:$0xff] %vm79_vm2, %v72_v7  ;;  %v250_v8 = vpop.f32.mrb[1].mxu0 }
  0xdd   :  { %v75_v9 = vpop.f32.mrb[2].mxu0 }
  0xde   :  { %81 = vst.msk [vmem:[#allocation2 + $0x8] sm:$0xff] %vm79_vm2, %v75_v9  ;;  %v251_v10 = vpop.f32.mrb[3].mxu0 }
 0x14a   :  { %v131_v12 = vpop.f32.mrb[0].mxu1 }
 0x14b   :  { %140 = vrot.lane.b32.xlu0 %v131_v12, %s300_s24  ;;  %v256_v13 = vpop.f32.mrb[1].mxu1 }
 0x14c   :  { %v134_v14 = vpop.f32.mrb[2].mxu1 }
 0x14d   :  { %142 = vrot.lane.b32.xlu1 %v134_v14, %s300_s24  ;;  %v257_v15 = vpop.f32.mrb[3].mxu1 }
 0x1bd   :  { %v141_v16 = vpop.permute.xlu0 %140 }
 0x1be   :  { %147 = vst.msk [vmem:[#allocation2] sm:$0xff] %vm146_vm3, %v141_v16 }
 0x1bf   :  { %v143_v17 = vpop.permute.xlu1 %142 }
 0x1c0   :  { %148 = vst.msk [vmem:[#allocation2 + $0x8] sm:$0xff] %vm146_vm3, %v143_v17 }
 0x1c5   :  { %v149_v18 = vld [vmem:[#allocation2] sm:$0xff] }
 0x1c7   :  { %v150_v19 = vld [vmem:[#allocation2 + $0x8] sm:$0xff] }
 0x1c8   :  { %v151_v20 = vpack.c.bf16 %v150_v19, %v149_v18 }
 0x1ca   :  { %261 = vmatmul.mubr.msk.bf16.vlgmr.msra.gmra.mrb[4].mxu0 %vm34_vm1, %v151_v20 }
 0x29d   :  { %v205_v22 = vpop.f32.mrb[4].mxu0 }
 0x29e   :  { %v206_v23 = vadd.f32 %v237_v21, %v205_v22  ;;  %v262_v24 = vpop.f32.mrb[5].mxu0 }
 0x29f   :  { %v208_v25 = vpop.f32.mrb[6].mxu0 }
 0x2a0   :  { %213 = vst.msk [vmem:[#allocation3] sm:$0xff] %vm212_vm4, %v206_v23  ;;  %v209_v26 = vadd.f32 %v237_v21, %v208_v25  ;;  %v263_v27 = vpop.f32.mrb[7].mxu0 }
 0x2a2   :  { %214 = vst.msk [vmem:[#allocation3 + $0x8] sm:$0xff] %vm212_vm4, %v209_v26 }
 0x2a3   :  { %284 = shalt.err (!%p281_p4)
}
 0x2a4   :  { %s285_s30 = scalar_lea.hbm %s368_s4, 256 }
 0x2a5   :  { %p286_p5 = scmp.ne.s32.totalorder %s368_s4, %s285_s30  ;;  %p289_p6 = scmp.lt.u32.totalorder %s285_s30, %s368_s4 }
 0x2a7   :  { %p291_p7 = pnand %p289_p6, %p286_p5 }
 0x2a9   :  { %294 = shalt.err (!%p291_p7)
}
 0x2aa   :  { %s302_s9 = smov 128  }
 0x2ab   :  { %226 = dma.vmem_to_hbm [thread:$0]  %s221_s27, 256, %s368_s4, [#allocation4], %s302_s9, %s302_s9, %s300_s24  }
 0x2ac   :  { %295 = dma.done.wait [#allocation4], 256  }
 0x2ad   :  { %296 = vsyncadd [#allocation4], 4294967040 }
 0x2ae   :  { %230 = vsyncpa [#allocation4], 1 }

</bundles_post_ra>
